<compile_context>
chip_gen: v7x
topology: tpu7x:2x2x1
jax: 0.10.0
libtpu: 0.0.40
codegen_flags: <defaults>
</compile_context>

<pallas_src>
import functools

import jax
import jax.numpy as jnp
from jax.experimental import pallas as pl
from jax.experimental.pallas import tpu as pltpu

LANE = 128       # vreg lane width
SUBLANE = 8      # f32 sublane count
NEG_SLOPE = 0.1  # LeakyReLU negative slope
EPS = 1e-20


def _round_up(n, m):
    return ((n + m - 1) // m) * m


def _generator_kernel(x_ref,
                      w1_ref, b1_ref,
                      w2_ref, b2_ref,
                      w3_ref, b3_ref,
                      w4_ref, b4_ref,
                      w5_ref, b5_ref,
                      o_ref):
    """One batch tile: 5 MXU matmuls (bf16 inputs, f32 accumulation) + VPU LeakyReLU."""

    def leaky_relu(v):
        # single VPU max per vreg instead of compare + select
        return jnp.maximum(v, NEG_SLOPE * v)

    def layer(h, w_ref, b_ref):
        return jnp.dot(h.astype(w_ref.dtype), w_ref[...],
                       preferred_element_type=jnp.float32) + b_ref[...]

    h = leaky_relu(layer(x_ref[...], w1_ref, b1_ref))
    h = leaky_relu(layer(h, w2_ref, b2_ref))
    h = leaky_relu(layer(h, w3_ref, b3_ref))
    h = leaky_relu(layer(h, w4_ref, b4_ref))
    # eps is already folded into b5 (see prepare_padded_params)
    o_ref[...] = layer(h, w5_ref, b5_ref).astype(o_ref.dtype)


def init_params(key, input_neurons, hidden_neurons, output_neurons):
    """Deterministic init mimicking nn.Linear's U(-1/sqrt(fan_in), 1/sqrt(fan_in)).

    Weights are stored as [in, out] (transpose of torch's [out, in]) so the
    kernel computes plain x @ W; biases are [1, out].
    """
    dims = [(input_neurons, hidden_neurons),
            (hidden_neurons, hidden_neurons),
            (hidden_neurons, hidden_neurons),
            (hidden_neurons, hidden_neurons),
            (hidden_neurons, output_neurons)]
    params = {}
    for i, (fan_in, fan_out) in enumerate(dims, start=1):
        key, kw, kb = jax.random.split(key, 3)
        bound = 1.0 / jnp.sqrt(float(fan_in))
        params[f"w{i}"] = jax.random.uniform(
            kw, (fan_in, fan_out), jnp.float32, -bound, bound)
        params[f"b{i}"] = jax.random.uniform(
            kb, (1, fan_out), jnp.float32, -bound, bound)
    return params


def prepare_padded_params(params, eps=EPS):
    """Pad feature dims to 128 lanes; weights -> bf16 (MXU input), biases f32."""
    padded = []
    for i in range(1, 6):
        w = params[f"w{i}"]
        b = params[f"b{i}"]
        if i == 5:
            b = b + eps  # fold the +eps of forward() into the final bias
        ip = _round_up(w.shape[0], LANE)
        op = _round_up(w.shape[1], LANE)
        w_p = jnp.zeros((ip, op), jnp.bfloat16)
        w_p = w_p.at[:w.shape[0], :w.shape[1]].set(w.astype(jnp.bfloat16))
        b_p = jnp.zeros((1, op), jnp.float32)
        b_p = b_p.at[:, :b.shape[1]].set(b.astype(jnp.float32))
        padded += [w_p, b_p]
    return tuple(padded)


@functools.partial(jax.jit, static_argnames=("out_dim", "block_batch"))
def generator_forward(x, padded_params, *, out_dim, block_batch=512):
    """x: [batch, in_features] f32; padded_params from prepare_padded_params."""
    batch, in_dim = x.shape
    in_p = padded_params[0].shape[0]    # padded input features
    out_p = padded_params[-2].shape[1]  # padded output features (multiple of 128)

    # batch tile: multiple of the 8-row sublane, capped by block_batch
    tb = _round_up(min(block_batch, _round_up(batch, SUBLANE)), SUBLANE)
    batch_p = _round_up(batch, tb)

    # zero-pad activations to (batch_p, 128-multiple)
    x_p = jnp.zeros((batch_p, in_p), x.dtype).at[:batch, :in_dim].set(x)

    # weights / biases are grid-invariant -> resident in VMEM across all tiles
    def resident(shape):
        return pl.BlockSpec(shape, lambda i: (0, 0))

    in_specs = [pl.BlockSpec((tb, in_p), lambda i: (i, 0))]
    for k in range(0, len(padded_params), 2):
        in_specs.append(resident(padded_params[k].shape))      # weight
        in_specs.append(resident(padded_params[k + 1].shape))  # bias

    y_p = pl.pallas_call(
        _generator_kernel,
        out_shape=jax.ShapeDtypeStruct((batch_p, out_p), x.dtype),
        grid=(batch_p // tb,),
        in_specs=in_specs,
        out_specs=pl.BlockSpec((tb, out_p), lambda i: (i, 0)),
        compiler_params=pltpu.CompilerParams(
            dimension_semantics=("parallel",)),
    )(x_p, *padded_params)

    # drop batch / lane padding
    return y_p[:batch, :out_dim]


def reference_forward_bf16(x, params):
    """Pure-JAX reference using the same bf16-input / f32-accum matmul recipe."""
    def leaky(v):
        return jnp.maximum(v, NEG_SLOPE * v)

    def layer(h, w, b):
        return jnp.dot(h.astype(jnp.bfloat16), w.astype(jnp.bfloat16),
                       preferred_element_type=jnp.float32) + b

    h = leaky(layer(x, params["w1"], params["b1"]))
    h = leaky(layer(h, params["w2"], params["b2"]))
    h = leaky(layer(h, params["w3"], params["b3"]))
    h = leaky(layer(h, params["w4"], params["b4"]))
    return layer(h, params["w5"], params["b5"]) + EPS


def reference_forward_f32(x, params):
    """Pure-f32 reference of the original PyTorch forward()."""
    def leaky(v):
        return jnp.where(v > 0, v, NEG_SLOPE * v)
    h = leaky(x @ params["w1"] + params["b1"])
    h = leaky(h @ params["w2"] + params["b2"])
    h = leaky(h @ params["w3"] + params["b3"])
    h = leaky(h @ params["w4"] + params["b4"])
    return h @ params["w5"] + params["b5"] + EPS


if __name__ == "__main__":
    input_neurons, hidden_neurons, output_neurons = 16, 32, 8
    batch = 64

    key = jax.random.PRNGKey(0)
    key, kx = jax.random.split(key)
    x = jax.random.normal(kx, (batch, input_neurons), jnp.float32)
    params = init_params(key, input_neurons, hidden_neurons, output_neurons)

    padded_params = prepare_padded_params(params)

    # small block_batch so the batch grid actually has >1 step at this size
    y = generator_forward(x, padded_params, out_dim=output_neurons, block_batch=32)
    y = jax.block_until_ready(y)

    assert y.shape == (batch, output_neurons)

    # check against a reference that mirrors the bf16-matmul / f32-accum recipe
    y_ref_bf16 = reference_forward_bf16(x, params)
    assert jnp.allclose(y, y_ref_bf16, atol=1e-2, rtol=1e-2), "mismatch vs bf16 reference"

    # sanity check against the exact f32 semantics of the PyTorch module
    # (tolerance covers bf16 weight/activation quantization only)
    y_ref_f32 = reference_forward_f32(x, params)
    assert jnp.allclose(y, y_ref_f32, atol=5e-2, rtol=5e-2), "mismatch vs f32 reference"

    print("KERNEL_OK")
</pallas_src>

<mosaic_0001>
module attributes {stable_mosaic.version = 11 : i64} {
  func.func @_generator_kernel(%arg0: i32, %arg1: memref<32x128xf32, #tpu.memory_space<vmem>>, %arg2: memref<128x128xbf16, #tpu.memory_space<vmem>>, %arg3: memref<1x128xf32, #tpu.memory_space<vmem>>, %arg4: memref<128x128xbf16, #tpu.memory_space<vmem>>, %arg5: memref<1x128xf32, #tpu.memory_space<vmem>>, %arg6: memref<128x128xbf16, #tpu.memory_space<vmem>>, %arg7: memref<1x128xf32, #tpu.memory_space<vmem>>, %arg8: memref<128x128xbf16, #tpu.memory_space<vmem>>, %arg9: memref<1x128xf32, #tpu.memory_space<vmem>>, %arg10: memref<128x128xbf16, #tpu.memory_space<vmem>>, %arg11: memref<1x128xf32, #tpu.memory_space<vmem>>, %arg12: memref<32x128xf32, #tpu.memory_space<vmem>>) attributes {dimension_semantics = [#tpu.dimension_semantics<parallel>], iteration_bounds = array<i64: 2>, scalar_prefetch = 0 : i64, scratch_operands = 0 : i64, tpu.core_type = #tpu.core_type<tc>, window_params = [{transform_indices = @transform_0, window_bounds = array<i64: 32, 128>}, {pipeline_mode = #tpu.pipeline_mode<synchronous>, transform_indices = @transform_1, window_bounds = array<i64: 128, 128>}, {pipeline_mode = #tpu.pipeline_mode<synchronous>, transform_indices = @transform_2, window_bounds = array<i64: 1, 128>}, {pipeline_mode = #tpu.pipeline_mode<synchronous>, transform_indices = @transform_3, window_bounds = array<i64: 128, 128>}, {pipeline_mode = #tpu.pipeline_mode<synchronous>, transform_indices = @transform_4, window_bounds = array<i64: 1, 128>}, {pipeline_mode = #tpu.pipeline_mode<synchronous>, transform_indices = @transform_5, window_bounds = array<i64: 128, 128>}, {pipeline_mode = #tpu.pipeline_mode<synchronous>, transform_indices = @transform_6, window_bounds = array<i64: 1, 128>}, {pipeline_mode = #tpu.pipeline_mode<synchronous>, transform_indices = @transform_7, window_bounds = array<i64: 128, 128>}, {pipeline_mode = #tpu.pipeline_mode<synchronous>, transform_indices = @transform_8, window_bounds = array<i64: 1, 128>}, {pipeline_mode = #tpu.pipeline_mode<synchronous>, transform_indices = @transform_9, window_bounds = array<i64: 128, 128>}, {pipeline_mode = #tpu.pipeline_mode<synchronous>, transform_indices = @transform_10, window_bounds = array<i64: 1, 128>}, {transform_indices = @transform_11, window_bounds = array<i64: 32, 128>}]} {
    %c0 = arith.constant 0 : index
    %c0_0 = arith.constant 0 : index
    %0 = vector.load %arg1[%c0, %c0_0] : memref<32x128xf32, #tpu.memory_space<vmem>>, vector<32x128xf32>
    %1 = arith.truncf %0 : vector<32x128xf32> to vector<32x128xbf16>
    %c0_1 = arith.constant 0 : index
    %c0_2 = arith.constant 0 : index
    %2 = vector.load %arg2[%c0_1, %c0_2] : memref<128x128xbf16, #tpu.memory_space<vmem>>, vector<128x128xbf16>
    %cst = arith.constant dense<0.000000e+00> : vector<32x128xf32>
    %3 = tpu.matmul %1, %2, %cst {dimension_numbers = #tpu.dot_dimension_numbers<[1], [0], [0], [1], [0, 0, 1, 1], [], []>} : vector<32x128xbf16>, vector<128x128xbf16>, vector<32x128xf32> -> vector<32x128xf32>
    %c0_3 = arith.constant 0 : index
    %c0_4 = arith.constant 0 : index
    %4 = vector.load %arg3[%c0_3, %c0_4] : memref<1x128xf32, #tpu.memory_space<vmem>>, vector<1x128xf32>
    %5 = vector.broadcast %4 : vector<1x128xf32> to vector<32x128xf32>
    %6 = arith.addf %3, %5 : vector<32x128xf32>
    %cst_5 = arith.constant 1.000000e-01 : f32
    %7 = vector.broadcast %cst_5 : f32 to vector<32x128xf32>
    %8 = arith.mulf %7, %6 : vector<32x128xf32>
    %9 = arith.maximumf %6, %8 : vector<32x128xf32>
    %10 = arith.truncf %9 : vector<32x128xf32> to vector<32x128xbf16>
    %c0_6 = arith.constant 0 : index
    %c0_7 = arith.constant 0 : index
    %11 = vector.load %arg4[%c0_6, %c0_7] : memref<128x128xbf16, #tpu.memory_space<vmem>>, vector<128x128xbf16>
    %cst_8 = arith.constant dense<0.000000e+00> : vector<32x128xf32>
    %12 = tpu.matmul %10, %11, %cst_8 {dimension_numbers = #tpu.dot_dimension_numbers<[1], [0], [0], [1], [0, 0, 1, 1], [], []>} : vector<32x128xbf16>, vector<128x128xbf16>, vector<32x128xf32> -> vector<32x128xf32>
    %c0_9 = arith.constant 0 : index
    %c0_10 = arith.constant 0 : index
    %13 = vector.load %arg5[%c0_9, %c0_10] : memref<1x128xf32, #tpu.memory_space<vmem>>, vector<1x128xf32>
    %14 = vector.broadcast %13 : vector<1x128xf32> to vector<32x128xf32>
    %15 = arith.addf %12, %14 : vector<32x128xf32>
    %cst_11 = arith.constant 1.000000e-01 : f32
    %16 = vector.broadcast %cst_11 : f32 to vector<32x128xf32>
    %17 = arith.mulf %16, %15 : vector<32x128xf32>
    %18 = arith.maximumf %15, %17 : vector<32x128xf32>
    %19 = arith.truncf %18 : vector<32x128xf32> to vector<32x128xbf16>
    %c0_12 = arith.constant 0 : index
    %c0_13 = arith.constant 0 : index
    %20 = vector.load %arg6[%c0_12, %c0_13] : memref<128x128xbf16, #tpu.memory_space<vmem>>, vector<128x128xbf16>
    %cst_14 = arith.constant dense<0.000000e+00> : vector<32x128xf32>
    %21 = tpu.matmul %19, %20, %cst_14 {dimension_numbers = #tpu.dot_dimension_numbers<[1], [0], [0], [1], [0, 0, 1, 1], [], []>} : vector<32x128xbf16>, vector<128x128xbf16>, vector<32x128xf32> -> vector<32x128xf32>
    %c0_15 = arith.constant 0 : index
    %c0_16 = arith.constant 0 : index
    %22 = vector.load %arg7[%c0_15, %c0_16] : memref<1x128xf32, #tpu.memory_space<vmem>>, vector<1x128xf32>
    %23 = vector.broadcast %22 : vector<1x128xf32> to vector<32x128xf32>
    %24 = arith.addf %21, %23 : vector<32x128xf32>
    %cst_17 = arith.constant 1.000000e-01 : f32
    %25 = vector.broadcast %cst_17 : f32 to vector<32x128xf32>
    %26 = arith.mulf %25, %24 : vector<32x128xf32>
    %27 = arith.maximumf %24, %26 : vector<32x128xf32>
    %28 = arith.truncf %27 : vector<32x128xf32> to vector<32x128xbf16>
    %c0_18 = arith.constant 0 : index
    %c0_19 = arith.constant 0 : index
    %29 = vector.load %arg8[%c0_18, %c0_19] : memref<128x128xbf16, #tpu.memory_space<vmem>>, vector<128x128xbf16>
    %cst_20 = arith.constant dense<0.000000e+00> : vector<32x128xf32>
    %30 = tpu.matmul %28, %29, %cst_20 {dimension_numbers = #tpu.dot_dimension_numbers<[1], [0], [0], [1], [0, 0, 1, 1], [], []>} : vector<32x128xbf16>, vector<128x128xbf16>, vector<32x128xf32> -> vector<32x128xf32>
    %c0_21 = arith.constant 0 : index
    %c0_22 = arith.constant 0 : index
    %31 = vector.load %arg9[%c0_21, %c0_22] : memref<1x128xf32, #tpu.memory_space<vmem>>, vector<1x128xf32>
    %32 = vector.broadcast %31 : vector<1x128xf32> to vector<32x128xf32>
    %33 = arith.addf %30, %32 : vector<32x128xf32>
    %cst_23 = arith.constant 1.000000e-01 : f32
    %34 = vector.broadcast %cst_23 : f32 to vector<32x128xf32>
    %35 = arith.mulf %34, %33 : vector<32x128xf32>
    %36 = arith.maximumf %33, %35 : vector<32x128xf32>
    %37 = arith.truncf %36 : vector<32x128xf32> to vector<32x128xbf16>
    %c0_24 = arith.constant 0 : index
    %c0_25 = arith.constant 0 : index
    %38 = vector.load %arg10[%c0_24, %c0_25] : memref<128x128xbf16, #tpu.memory_space<vmem>>, vector<128x128xbf16>
    %cst_26 = arith.constant dense<0.000000e+00> : vector<32x128xf32>
    %39 = tpu.matmul %37, %38, %cst_26 {dimension_numbers = #tpu.dot_dimension_numbers<[1], [0], [0], [1], [0, 0, 1, 1], [], []>} : vector<32x128xbf16>, vector<128x128xbf16>, vector<32x128xf32> -> vector<32x128xf32>
    %c0_27 = arith.constant 0 : index
    %c0_28 = arith.constant 0 : index
    %40 = vector.load %arg11[%c0_27, %c0_28] : memref<1x128xf32, #tpu.memory_space<vmem>>, vector<1x128xf32>
    %41 = vector.broadcast %40 : vector<1x128xf32> to vector<32x128xf32>
    %42 = arith.addf %39, %41 : vector<32x128xf32>
    %c0_29 = arith.constant 0 : index
    %c0_30 = arith.constant 0 : index
    %43 = vector.load %arg12[%c0_29, %c0_30] : memref<32x128xf32, #tpu.memory_space<vmem>>, vector<32x128xf32>
    tpu.vector_store %arg12[%c0_29, %c0_30], %42 {strides = array<i32>} : memref<32x128xf32, #tpu.memory_space<vmem>>, vector<32x128xf32>,
    return
  }
  func.func @transform_0(%arg0: i32) -> (i32, i32) {
    %c0_i32 = arith.constant 0 : i32
    %c0_i32_0 = arith.constant 0 : i32
    return %arg0, %c0_i32 : i32, i32
  }
  func.func @transform_1(%arg0: i32) -> (i32, i32) {
    %c0_i32 = arith.constant 0 : i32
    %c0_i32_0 = arith.constant 0 : i32
    %c0_i32_1 = arith.constant 0 : i32
    return %c0_i32, %c0_i32_0 : i32, i32
  }
  func.func @transform_2(%arg0: i32) -> (i32, i32) {
    %c0_i32 = arith.constant 0 : i32
    %c0_i32_0 = arith.constant 0 : i32
    %c0_i32_1 = arith.constant 0 : i32
    return %c0_i32, %c0_i32_0 : i32, i32
  }
  func.func @transform_3(%arg0: i32) -> (i32, i32) {
    %c0_i32 = arith.constant 0 : i32
    %c0_i32_0 = arith.constant 0 : i32
    %c0_i32_1 = arith.constant 0 : i32
    return %c0_i32, %c0_i32_0 : i32, i32
  }
  func.func @transform_4(%arg0: i32) -> (i32, i32) {
    %c0_i32 = arith.constant 0 : i32
    %c0_i32_0 = arith.constant 0 : i32
    %c0_i32_1 = arith.constant 0 : i32
    return %c0_i32, %c0_i32_0 : i32, i32
  }
  func.func @transform_5(%arg0: i32) -> (i32, i32) {
    %c0_i32 = arith.constant 0 : i32
    %c0_i32_0 = arith.constant 0 : i32
    %c0_i32_1 = arith.constant 0 : i32
    return %c0_i32, %c0_i32_0 : i32, i32
  }
  func.func @transform_6(%arg0: i32) -> (i32, i32) {
    %c0_i32 = arith.constant 0 : i32
    %c0_i32_0 = arith.constant 0 : i32
    %c0_i32_1 = arith.constant 0 : i32
    return %c0_i32, %c0_i32_0 : i32, i32
  }
  func.func @transform_7(%arg0: i32) -> (i32, i32) {
    %c0_i32 = arith.constant 0 : i32
    %c0_i32_0 = arith.constant 0 : i32
    %c0_i32_1 = arith.constant 0 : i32
    return %c0_i32, %c0_i32_0 : i32, i32
  }
  func.func @transform_8(%arg0: i32) -> (i32, i32) {
    %c0_i32 = arith.constant 0 : i32
    %c0_i32_0 = arith.constant 0 : i32
    %c0_i32_1 = arith.constant 0 : i32
    return %c0_i32, %c0_i32_0 : i32, i32
  }
  func.func @transform_9(%arg0: i32) -> (i32, i32) {
    %c0_i32 = arith.constant 0 : i32
    %c0_i32_0 = arith.constant 0 : i32
    %c0_i32_1 = arith.constant 0 : i32
    return %c0_i32, %c0_i32_0 : i32, i32
  }
  func.func @transform_10(%arg0: i32) -> (i32, i32) {
    %c0_i32 = arith.constant 0 : i32
    %c0_i32_0 = arith.constant 0 : i32
    %c0_i32_1 = arith.constant 0 : i32
    return %c0_i32, %c0_i32_0 : i32, i32
  }
  func.func @transform_11(%arg0: i32) -> (i32, i32) {
    %c0_i32 = arith.constant 0 : i32
    %c0_i32_0 = arith.constant 0 : i32
    return %arg0, %c0_i32 : i32, i32
  }
}

</mosaic_0001>

<bundles_post_ra>
// kernel: generator_forward.1
= control target key start
LH: loop header
LB: loop body
LE: loop exit
PB: predicated region body
PF: predicated region fallthrough
CT: control target
= control target key end

     0   :  { %s1419_s17 = smov 0   ;;  %s1584_s0 = inlined_call_operand.vmem [shape: f32[64,128], index: 0, kind: input, shape index: {}]   ;;  %s1585_s1 = inlined_call_operand.vmem [shape: bf16[128,128], index: 1, kind: input, shape index: {}]   ;;  %s1586_s2 = inlined_call_operand.vmem [shape: f32[1,128], index: 2, kind: input, shape index: {}]   ;;  %s1587_s3 = inlined_call_operand.vmem [shape: bf16[128,128], index: 3, kind: input, shape index: {}]   ;;  %s1588_s4 = inlined_call_operand.vmem [shape: f32[1,128], index: 4, kind: input, shape index: {}]   ;;  %s1589_s5 = inlined_call_operand.vmem [shape: bf16[128,128], index: 5, kind: input, shape index: {}]   ;;  %s1590_s6 = inlined_call_operand.vmem [shape: f32[1,128], index: 6, kind: input, shape index: {}]   ;;  %s1591_s7 = inlined_call_operand.vmem [shape: bf16[128,128], index: 7, kind: input, shape index: {}]   ;;  %s1592_s8 = inlined_call_operand.vmem [shape: f32[1,128], index: 8, kind: input, shape index: {}]   ;;  %s1593_s9 = inlined_call_operand.vmem [shape: bf16[128,128], index: 9, kind: input, shape index: {}]   ;;  %s1594_s10 = inlined_call_operand.vmem [shape: f32[1,128], index: 10, kind: input, shape index: {}]   ;;  %s1595_s11 = inlined_call_operand.vmem [shape: f32[64,128], index: 11, kind: output, shape index: {}]  }
   0x1 LB: > { %s1097_s18 = sadd.s32 4294967295, %s1357_s17   ;;  %p1101_p0 = scmp.ge.s32.totalorder %s1357_s17, 1  ;;  %s1357_s17 = sphi %s1419_s17, %s21_s17  }
   0x2   : > { %p338_p1 = scmp.lt.s32.totalorder %s1357_s17, 3 }
   0x4   : > { %p339_p2 = pnand %p1101_p0, %p338_p1 }
   0x5   : > { %v1311_v0 = vld [vmem:[%s1585_s1] sm:$0xff] (!%p339_p2)   ;;  %s1102_s21 = sshll.u32 (!%p339_p2), %s1097_s18, 2  ;;  %v1312_v1 = vld [vmem:[%s1585_s1 + $0x8] sm:$0xff] (!%p339_p2)   ;;  %v1313_v2 = vld [vmem:[%s1585_s1 + $0x10] sm:$0xff] (!%p339_p2)  }
   0x6   : > { %342 = sbr.rel (%p339_p2) target bundleno = 1152 (0x480), region = 64  ;;  %p379_p3 = scmp.lt.s32.totalorder (!%p339_p2), %s1102_s21, 7  ;;  %1203 = vmatprep.subr.bf16.mxu0 (!%p339_p2), %v1311_v0  ;;  %v1314_v3 = vld [vmem:[%s1585_s1 + $0x18] sm:$0xff] (!%p339_p2)   ;;  %v1319_v7 = vld [vmem:[%s1587_s3] sm:$0xff] (!%p339_p2)   ;;  %v1320_v8 = vld [vmem:[%s1587_s3 + $0x8] sm:$0xff] (!%p339_p2)  }
   0x7   : > { %1204 = vmatpush3.bf16.msra.mxu0 (!%p339_p2), %v1311_v0  ;;  %v1315_v9 = vld [vmem:[%s1585_s1 + $0x20] sm:$0xff] (!%p339_p2)   ;;  %1223 = vmatprep.subr.bf16.mxu1 (!%p339_p2), %v1319_v7  ;;  %v1316_v10 = vld [vmem:[%s1585_s1 + $0x28] sm:$0xff] (!%p339_p2)   ;;  %v1321_v11 = vld [vmem:[%s1587_s3 + $0x10] sm:$0xff] (!%p339_p2)  }
   0x8   : > { %1205 = vmatprep.subr.bf16.mxu0 (!%p339_p2), %v1312_v1  ;;  %1224 = vmatpush3.bf16.msra.mxu1 (!%p339_p2), %v1319_v7  ;;  %v1322_v12 = vld [vmem:[%s1587_s3 + $0x18] sm:$0xff] (!%p339_p2)   ;;  %v1317_v13 = vld [vmem:[%s1585_s1 + $0x30] sm:$0xff] (!%p339_p2)   ;;  %v1323_v14 = vld [vmem:[%s1587_s3 + $0x20] sm:$0xff] (!%p339_p2)  }
   0x9   : > { %1225 = vmatprep.subr.bf16.mxu1 (!%p339_p2), %v1320_v8  ;;  %v1318_v15 = vld [vmem:[%s1585_s1 + $0x38] sm:$0xff] (!%p339_p2)   ;;  %v1324_v19 = vld [vmem:[%s1587_s3 + $0x28] sm:$0xff] (!%p339_p2)   ;;  %v1325_v20 = vld [vmem:[%s1587_s3 + $0x30] sm:$0xff] (!%p339_p2)  }
   0xa   : > { %v1326_v21 = vld [vmem:[%s1587_s3 + $0x38] sm:$0xff] (!%p339_p2)   ;;  %v1327_v22 = vld [vmem:[%s1589_s5] sm:$0xff] (!%p339_p2)   ;;  %v1328_v23 = vld [vmem:[%s1589_s5 + $0x8] sm:$0xff] (!%p339_p2)  }
   0xb   : > { %1206 = vmatpush3.bf16.msra.mxu0 (!%p339_p2), %v1312_v1  ;;  %v1329_v24 = vld [vmem:[%s1589_s5 + $0x10] sm:$0xff] (!%p339_p2)   ;;  %v1330_v25 = vld [vmem:[%s1589_s5 + $0x18] sm:$0xff] (!%p339_p2)   ;;  %v1331_v26 = vld [vmem:[%s1589_s5 + $0x20] sm:$0xff] (!%p339_p2)  }
   0xc   : > { %1207 = vmatprep.subr.bf16.mxu0 (!%p339_p2), %v1313_v2  ;;  %1226 = vmatpush3.bf16.msra.mxu1 (!%p339_p2), %v1320_v8  ;;  %v1106_v27 = vld [vmem:[%s1586_s2] ss:$0 sm:$0xff] (!%p339_p2)  ;;  %v1332_v46 = vld [vmem:[%s1589_s5 + $0x28] sm:$0xff] (!%p339_p2)   ;;  %v1333_v47 = vld [vmem:[%s1589_s5 + $0x30] sm:$0xff] (!%p339_p2)  }
   0xd   : > { %s1597_s21 = smov (!%p379_p3, %s1102_s21), 7  ;;  %1227 = vmatprep.subr.bf16.mxu1 %v1321_v11  ;;  %v1334_v48 = vld [vmem:[%s1589_s5 + $0x38] sm:$0xff]   ;;  %v1335_v49 = vld [vmem:[%s1591_s7] sm:$0xff]   ;;  %v1336_v50 = vld [vmem:[%s1591_s7 + $0x8] sm:$0xff]  }
   0xe   : > { %s1103_s26 = sshll.u32 %s1597_s21, 3  ;;  %v1337_v51 = vld [vmem:[%s1591_s7 + $0x10] sm:$0xff]   ;;  %v1338_v52 = vld [vmem:[%s1591_s7 + $0x18] sm:$0xff]   ;;  %v1339_v53 = vld [vmem:[%s1591_s7 + $0x20] sm:$0xff]  }
   0xf   : > { %s1444_s29 = scalar_lea.vmem %s1584_s0, %s1103_s26  ;;  %1208 = vmatpush3.bf16.msra.mxu0 %v1313_v2  ;;  %v1115_v54 = vld [vmem:[%s1588_s4] ss:$0 sm:$0xff]  ;;  %s388_s19 = scalar_lea.vmem %s1595_s11, %s1103_s26 }
  0x10   : > { %v391_v4 = vld [vmem:[%s1444_s29] sm:$0xff]  ;;  %v392_v5 = vld [vmem:[%s1444_s29 + $0x8] sm:$0xff]  ;;  %1209 = vmatprep.subr.bf16.mxu0 %v1314_v3  ;;  %1228 = vmatpush3.bf16.msra.mxu1 %v1321_v11  ;;  %v393_v16 = vld [vmem:[%s1444_s29 + $0x10] sm:$0xff] }
  0x11   : > { %v395_v6 = vpack.c.bf16 %v392_v5, %v391_v4  ;;  %1229 = vmatprep.subr.bf16.mxu1 %v1322_v12  ;;  %v394_v17 = vld [vmem:[%s1444_s29 + $0x18] sm:$0xff] }
  0x12   : > { %v396_v18 = vpack.c.bf16 %v394_v17, %v393_v16  ;;  %v1342_v11 = vld [vmem:[%s1591_s7 + $0x38] sm:$0xff]   ;;  %v1347_v16 = vld [vmem:[%s1593_s9 + $0x20] sm:$0xff]  }
  0x13   : > { %1219 = vmatprep.mubr.bf16.mxu0 %v395_v6  ;;  %1210 = vmatpush3.bf16.msra.mxu0 %v1314_v3  ;;  %v1124_v17 = vld [vmem:[%s1590_s6] ss:$0 sm:$0xff] }
  0x14   : > { %1211 = vmatprep.subr.bf16.mxu0 %v1315_v9  ;;  %1230 = vmatpush3.bf16.msra.mxu1 %v1322_v12  ;;  %v1343_v12 = vld [vmem:[%s1593_s9] sm:$0xff]  }
  0x15   : > { %1231 = vmatprep.subr.bf16.mxu1 %v1323_v14 }
  0x17   : > { %1212 = vmatpush3.bf16.msra.mxu0 %v1315_v9  ;;  %v1340_v9 = vld [vmem:[%s1591_s7 + $0x28] sm:$0xff]  }
  0x18   : > { %1213 = vmatprep.subr.bf16.mxu0 %v1316_v10  ;;  %1232 = vmatpush3.bf16.msra.mxu1 %v1323_v14  ;;  %v1345_v14 = vld [vmem:[%s1593_s9 + $0x10] sm:$0xff]  }
  0x19   : > { %1233 = vmatprep.subr.bf16.mxu1 %v1324_v19 }
  0x1b   : > { %1214 = vmatpush3.bf16.msra.mxu0 %v1316_v10  ;;  %v1341_v10 = vld [vmem:[%s1591_s7 + $0x30] sm:$0xff]  }
  0x1c   : > { %1215 = vmatprep.subr.bf16.mxu0 %v1317_v13  ;;  %1234 = vmatpush3.bf16.msra.mxu1 %v1324_v19 }
  0x1d   : > { %1235 = vmatprep.subr.bf16.mxu1 %v1325_v20 }
  0x1f   : > { %1216 = vmatpush3.bf16.msra.mxu0 %v1317_v13  ;;  %v1344_v13 = vld [vmem:[%s1593_s9 + $0x8] sm:$0xff]  }
  0x20   : > { %1217 = vmatprep.subr.bf16.mxu0 %v1318_v15  ;;  %1236 = vmatpush3.bf16.msra.mxu1 %v1325_v20 }
  0x21   : > { %1237 = vmatprep.subr.bf16.mxu1 %v1326_v21 }
  0x23   : > { %1218 = vmatpush3.bf16.msra.mxu0 %v1318_v15  ;;  %v1346_v15 = vld [vmem:[%s1593_s9 + $0x18] sm:$0xff]  }
  0x24   : > { %1238 = vmatpush3.bf16.msra.mxu1 %v1326_v21  ;;  %1243 = vmatprep.subr.bf16.mxu0 %v1327_v22 }
  0x25   : > { %1263 = vmatprep.subr.bf16.mxu1 %v1335_v49 }
  0x26   : > { %1220 = vmatmul.mubr.bf16.vlgmr.msra.gmra.mrb[0].mxu0 %v396_v18 }
  0x27   : > { %1244 = vmatpush3.bf16.msra.mxu0 %v1327_v22 }
  0x28   : > { %1245 = vmatprep.subr.bf16.mxu0 %v1328_v23 }
  0x2b   : > { %1246 = vmatpush3.bf16.msra.mxu0 %v1328_v23 }
  0x2c   : > { %1247 = vmatprep.subr.bf16.mxu0 %v1329_v24 }
  0x2f   : > { %1248 = vmatpush3.bf16.msra.mxu0 %v1329_v24 }
  0x30   : > { %1249 = vmatprep.subr.bf16.mxu0 %v1330_v25 }
  0x33   : > { %1250 = vmatpush3.bf16.msra.mxu0 %v1330_v25 }
  0x34   : > { %1251 = vmatprep.subr.bf16.mxu0 %v1331_v26 }
  0x37   : > { %1252 = vmatpush3.bf16.msra.mxu0 %v1331_v26 }
  0x38   : > { %1253 = vmatprep.subr.bf16.mxu0 %v1332_v46 }
  0x3b   : > { %1254 = vmatpush3.bf16.msra.mxu0 %v1332_v46 }
  0x3c   : > { %1255 = vmatprep.subr.bf16.mxu0 %v1333_v47 }
  0x3f   : > { %1256 = vmatpush3.bf16.msra.mxu0 %v1333_v47 }
  0x40   : > { %1257 = vmatprep.subr.bf16.mxu0 %v1334_v48 }
  0x43   : > { %1258 = vmatpush3.bf16.msra.mxu0 %v1334_v48 }
  0x44   : > { %1283 = vmatprep.subr.bf16.mxu0 %v1343_v12 }
  0xf9   : > { %v1221_v28 = vpop.f32.mrb[0].mxu0 }
  0xfa   : > { %v511_v29 = vadd.f32 %v1221_v28, %v1106_v27  ;;  %v502_v30 = vpop.f32.mrb[1].mxu0 }
  0xfb   : > { %v503_v31 = vadd.f32 %v1106_v27, %v502_v30  ;;  %v1222_v32 = vpop.f32.mrb[2].mxu0 }
  0xfc   : > { %v519_v33 = vmul.f32 0.1, %v511_v29  ;;  %v514_v34 = vadd.f32 %v1222_v32, %v1106_v27  ;;  %v505_v35 = vpop.f32.mrb[3].mxu0 }
  0xfd   : > { %v517_v36 = vmul.f32 0.1, %v503_v31  ;;  %v506_v37 = vadd.f32 %v1106_v27, %v505_v35 }
  0xfe   : > { %v520_v38 = vmul.f32 0.1, %v514_v34  ;;  %v523_v40 = vmax.f32 %v511_v29, %v519_v33 }
  0xff   : > { %v518_v39 = vmul.f32 0.1, %v506_v37  ;;  %v521_v42 = vmax.f32 %v503_v31, %v517_v36  ;;  %v1348_v36 = vld [vmem:[%s1593_s9 + $0x28] sm:$0xff]  }
 0x100   : > { %v524_v41 = vmax.f32 %v514_v34, %v520_v38  ;;  %v1350_v38 = vld [vmem:[%s1593_s9 + $0x38] sm:$0xff]  }
 0x101   : > { %v522_v43 = vmax.f32 %v506_v37, %v518_v39  ;;  %v1349_v37 = vld [vmem:[%s1593_s9 + $0x30] sm:$0xff]   ;;  %v1133_v39 = vld [vmem:[%s1592_s8] ss:$0 sm:$0xff] }
 0x102   : > { %v526_v44 = vpack.c.bf16 %v524_v41, %v523_v40 }
 0x103   : > { %v525_v45 = vpack.c.bf16 %v522_v43, %v521_v42 }
 0x105   : > { %1239 = vmatprep.mubr.bf16.mxu1 %v525_v45 }
 0x106   : > { %1240 = vmatmul.mubr.bf16.vlgmr.msra.gmra.mrb[0].mxu1 %v526_v44 }
 0x107   : > { %1264 = vmatpush3.bf16.msra.mxu1 %v1335_v49 }
 0x108   : > { %1265 = vmatprep.subr.bf16.mxu1 %v1336_v50 }
 0x10b   : > { %1266 = vmatpush3.bf16.msra.mxu1 %v1336_v50 }
 0x10c   : > { %1267 = vmatprep.subr.bf16.mxu1 %v1337_v51 }
 0x10f   : > { %1268 = vmatpush3.bf16.msra.mxu1 %v1337_v51 }
 0x110   : > { %1269 = vmatprep.subr.bf16.mxu1 %v1338_v52 }
 0x113   : > { %1270 = vmatpush3.bf16.msra.mxu1 %v1338_v52 }
 0x114   : > { %1271 = vmatprep.subr.bf16.mxu1 %v1339_v53 }
 0x117   : > { %1272 = vmatpush3.bf16.msra.mxu1 %v1339_v53 }
 0x118   : > { %1273 = vmatprep.subr.bf16.mxu1 %v1340_v9 }
 0x11b   : > { %1274 = vmatpush3.bf16.msra.mxu1 %v1340_v9 }
 0x11c   : > { %1275 = vmatprep.subr.bf16.mxu1 %v1341_v10 }
 0x11f   : > { %1276 = vmatpush3.bf16.msra.mxu1 %v1341_v10 }
 0x120   : > { %1277 = vmatprep.subr.bf16.mxu1 %v1342_v11 }
 0x123   : > { %1278 = vmatpush3.bf16.msra.mxu1 %v1342_v11 }
 0x1d9   : > { %v1241_v55 = vpop.f32.mrb[0].mxu1 }
 0x1da   : > { %v641_v56 = vadd.f32 %v1241_v55, %v1115_v54  ;;  %v632_v57 = vpop.f32.mrb[1].mxu1 }
 0x1db   : > { %v633_v58 = vadd.f32 %v1115_v54, %v632_v57  ;;  %v1242_v59 = vpop.f32.mrb[2].mxu1 }
 0x1dc   : > { %v649_v60 = vmul.f32 0.1, %v641_v56  ;;  %v644_v61 = vadd.f32 %v1242_v59, %v1115_v54  ;;  %v635_v62 = vpop.f32.mrb[3].mxu1 }
 0x1dd   : > { %v647_v63 = vmul.f32 0.1, %v633_v58  ;;  %v636_v0 = vadd.f32 %v1115_v54, %v635_v62 }
 0x1de   : > { %v650_v1 = vmul.f32 0.1, %v644_v61  ;;  %v653_v3 = vmax.f32 %v641_v56, %v649_v60 }
 0x1df   : > { %v648_v2 = vmul.f32 0.1, %v636_v0  ;;  %v651_v5 = vmax.f32 %v633_v58, %v647_v63  ;;  %v1142_v58 = vld [vmem:[%s1594_s10] ss:$0 sm:$0xff] }
 0x1e0   : > { %v654_v4 = vmax.f32 %v644_v61, %v650_v1 }
 0x1e1   : > { %v652_v6 = vmax.f32 %v636_v0, %v648_v2 }
 0x1e2   : > { %v656_v7 = vpack.c.bf16 %v654_v4, %v653_v3 }
 0x1e3   : > { %v655_v8 = vpack.c.bf16 %v652_v6, %v651_v5 }
 0x1e5   : > { %1259 = vmatprep.mubr.bf16.mxu0 %v655_v8 }
 0x1e6   : > { %1260 = vmatmul.mubr.bf16.vlgmr.msra.gmra.mrb[4].mxu0 %v656_v7 }
 0x1e7   : > { %1284 = vmatpush3.bf16.msra.mxu0 %v1343_v12 }
 0x1e8   : > { %1285 = vmatprep.subr.bf16.mxu0 %v1344_v13 }
 0x1eb   : > { %1286 = vmatpush3.bf16.msra.mxu0 %v1344_v13 }
 0x1ec   : > { %1287 = vmatprep.subr.bf16.mxu0 %v1345_v14 }
 0x1ef   : > { %1288 = vmatpush3.bf16.msra.mxu0 %v1345_v14 }
 0x1f0   : > { %1289 = vmatprep.subr.bf16.mxu0 %v1346_v15 }
 0x1f3   : > { %1290 = vmatpush3.bf16.msra.mxu0 %v1346_v15 }
 0x1f4   : > { %1291 = vmatprep.subr.bf16.mxu0 %v1347_v16 }
 0x1f7   : > { %1292 = vmatpush3.bf16.msra.mxu0 %v1347_v16 }
 0x1f8   : > { %1293 = vmatprep.subr.bf16.mxu0 %v1348_v36 }
 0x1fb   : > { %1294 = vmatpush3.bf16.msra.mxu0 %v1348_v36 }
 0x1fc   : > { %1295 = vmatprep.subr.bf16.mxu0 %v1349_v37 }
 0x1ff   : > { %1296 = vmatpush3.bf16.msra.mxu0 %v1349_v37 }
 0x200   : > { %1297 = vmatprep.subr.bf16.mxu0 %v1350_v38 }
 0x203   : > { %1298 = vmatpush3.bf16.msra.mxu0 %v1350_v38 }
 0x2b9   : > { %v1261_v18 = vpop.f32.mrb[4].mxu0 }
 0x2ba   : > { %v771_v19 = vadd.f32 %v1261_v18, %v1124_v17  ;;  %v762_v20 = vpop.f32.mrb[5].mxu0 }
 0x2bb   : > { %v763_v21 = vadd.f32 %v1124_v17, %v762_v20  ;;  %v1262_v22 = vpop.f32.mrb[6].mxu0 }
 0x2bc   : > { %v779_v23 = vmul.f32 0.1, %v771_v19  ;;  %v774_v24 = vadd.f32 %v1262_v22, %v1124_v17  ;;  %v765_v25 = vpop.f32.mrb[7].mxu0 }
 0x2bd   : > { %v777_v26 = vmul.f32 0.1, %v763_v21  ;;  %v766_v27 = vadd.f32 %v1124_v17, %v765_v25 }
 0x2be   : > { %v780_v28 = vmul.f32 0.1, %v774_v24  ;;  %v783_v30 = vmax.f32 %v771_v19, %v779_v23 }
 0x2bf   : > { %v778_v29 = vmul.f32 0.1, %v766_v27  ;;  %v781_v32 = vmax.f32 %v763_v21, %v777_v26 }
 0x2c0   : > { %v784_v31 = vmax.f32 %v774_v24, %v780_v28 }
 0x2c1   : > { %v782_v33 = vmax.f32 %v766_v27, %v778_v29 }
 0x2c2   : > { %v786_v34 = vpack.c.bf16 %v784_v31, %v783_v30 }
 0x2c3   : > { %v785_v35 = vpack.c.bf16 %v782_v33, %v781_v32 }
 0x2c5   : > { %1279 = vmatprep.mubr.bf16.mxu1 %v785_v35 }
 0x2c6   : > { %1280 = vmatmul.mubr.bf16.vlgmr.msra.gmra.mrb[4].mxu1 %v786_v34 }
 0x399   : > { %v1281_v40 = vpop.f32.mrb[4].mxu1 }
 0x39a   : > { %v901_v41 = vadd.f32 %v1281_v40, %v1133_v39  ;;  %v892_v42 = vpop.f32.mrb[5].mxu1 }
 0x39b   : > { %v893_v43 = vadd.f32 %v1133_v39, %v892_v42  ;;  %v1282_v44 = vpop.f32.mrb[6].mxu1 }
 0x39c   : > { %v909_v45 = vmul.f32 0.1, %v901_v41  ;;  %v904_v46 = vadd.f32 %v1282_v44, %v1133_v39  ;;  %v895_v47 = vpop.f32.mrb[7].mxu1 }
 0x39d   : > { %v907_v48 = vmul.f32 0.1, %v893_v43  ;;  %v896_v49 = vadd.f32 %v1133_v39, %v895_v47 }
 0x39e   : > { %v910_v50 = vmul.f32 0.1, %v904_v46  ;;  %v913_v52 = vmax.f32 %v901_v41, %v909_v45 }
 0x39f   : > { %v908_v51 = vmul.f32 0.1, %v896_v49  ;;  %v911_v54 = vmax.f32 %v893_v43, %v907_v48 }
 0x3a0   : > { %v914_v53 = vmax.f32 %v904_v46, %v910_v50 }
 0x3a1   : > { %v912_v55 = vmax.f32 %v896_v49, %v908_v51 }
 0x3a2   : > { %v916_v56 = vpack.c.bf16 %v914_v53, %v913_v52 }
 0x3a3   : > { %v915_v57 = vpack.c.bf16 %v912_v55, %v911_v54 }
 0x3a5   : > { %1299 = vmatprep.mubr.bf16.mxu0 %v915_v57 }
 0x3a6   : > { %1300 = vmatmul.mubr.bf16.vlgmr.msra.gmra.mrb[8].mxu0 %v916_v56 }
 0x479   : > { %v1301_v59 = vpop.f32.mrb[8].mxu0 }
 0x47a   : > { %v1022_v60 = vpop.f32.mrb[9].mxu0  ;;  %v1031_v1 = vadd.f32 %v1301_v59, %v1142_v58 }
 0x47b   : > { %v1023_v61 = vadd.f32 %v1142_v58, %v1022_v60  ;;  %v1302_v62 = vpop.f32.mrb[10].mxu0 }
 0x47c   : > { %v1025_v63 = vpop.f32.mrb[11].mxu0  ;;  %v1034_v2 = vadd.f32 %v1302_v62, %v1142_v58  ;;  %1039 = vst [vmem:[%s388_s19 + $0x10] sm:$0xff] %v1031_v1 }
 0x47d   : > { %1037 = vst [vmem:[%s388_s19] sm:$0xff] %v1023_v61  ;;  %v1026_v0 = vadd.f32 %v1142_v58, %v1025_v63 }
 0x47e   : > { %1040 = vst [vmem:[%s388_s19 + $0x18] sm:$0xff] %v1034_v2 }
 0x47f   : > { %1038 = vst [vmem:[%s388_s19 + $0x8] sm:$0xff] %v1026_v0 }
 0x480 PF: > { %s21_s17 = sadd.s32 1, %s1357_s17  }
 0x481   : > { %p18_p4 = scmp.ge.s32.totalorder %s21_s17, 4  }
 0x483   :  { %20 = sbr.rel (!%p18_p4) target bundleno = 1 (0x1), region = 94 }

</bundles_post_ra>
